<compile_context>
chip_gen: v7x
topology: tpu7x:2x2x1
jax: 0.10.0
libtpu: 0.0.40
codegen_flags: <defaults>
</compile_context>

<pallas_src>
import jax
import jax.numpy as jnp
from jax.experimental import pallas as pl
from jax.experimental.pallas import tpu as pltpu


def _round_up(x, m):
    return ((x + m - 1) // m) * m


def mlp_kernel(x_ref, w1_ref, b1_ref, w2_ref, b2_ref, w3_ref, b3_ref, out_ref):
    # fc1 + ReLU (bf16 matmul inputs, f32 accumulation, f32 epilogue).
    h1 = jnp.dot(x_ref[...], w1_ref[...], preferred_element_type=jnp.float32)
    h1 = jnp.maximum(h1 + b1_ref[...], 0.0)
    # Dropout(p=0.5) -> identity in eval mode.
    # TODO(synk): training-mode dropout via pltpu.prng_random_bits if ever needed.
    # fc2 + ReLU
    h2 = jnp.dot(h1.astype(w2_ref.dtype), w2_ref[...],
                 preferred_element_type=jnp.float32)
    h2 = jnp.maximum(h2 + b2_ref[...], 0.0)
    # fc3 (no activation)
    out = jnp.dot(h2.astype(w3_ref.dtype), w3_ref[...],
                  preferred_element_type=jnp.float32)
    out_ref[...] = (out + b3_ref[...]).astype(out_ref.dtype)


def _pad_to(a, shape):
    pads = [(0, t - s) for s, t in zip(a.shape, shape)]
    return jnp.pad(a, pads)


def nn_forward(x, w1, b1, w2, b2, w3, b3, *, tm=256):
    """x: (batch, 784) f32; weights (in, out) f32; biases (1, out) f32."""
    batch, in_features = x.shape
    h1_dim, h2_dim, num_classes = w1.shape[1], w2.shape[1], w3.shape[1]

    # Lane-pad hidden / output widths: 500->512, 100->128, 10->128.
    h1p = _round_up(h1_dim, 128)
    h2p = _round_up(h2_dim, 128)
    ncp = _round_up(num_classes, 128)

    # Batch tile: fill the MXU M dimension when the batch allows it; for tiny
    # batches just use one (8-aligned) tile instead of padding to 256.
    tm = min(tm, _round_up(batch, 8))
    padded_batch = _round_up(batch, tm)
    grid = (padded_batch // tm,)

    # bf16 matmul operands (zero-padded); biases stay f32 for the f32 epilogue.
    xp = _pad_to(x, (padded_batch, in_features)).astype(jnp.bfloat16)
    w1p = _pad_to(w1, (in_features, h1p)).astype(jnp.bfloat16)
    w2p = _pad_to(w2, (h1p, h2p)).astype(jnp.bfloat16)
    w3p = _pad_to(w3, (h2p, ncp)).astype(jnp.bfloat16)
    b1p = _pad_to(b1, (1, h1p)).astype(jnp.float32)
    b2p = _pad_to(b2, (1, h2p)).astype(jnp.float32)
    b3p = _pad_to(b3, (1, ncp)).astype(jnp.float32)

    def resident(a):  # whole-array block, same block every grid step -> stays in VMEM
        return pl.BlockSpec(a.shape, lambda i: (0,) * a.ndim)

    flops = 2 * padded_batch * (in_features * h1p + h1p * h2p + h2p * ncp)
    bytes_accessed = (
        xp.size * 2
        + (w1p.size + w2p.size + w3p.size) * 2
        + (b1p.size + b2p.size + b3p.size) * 4
        + padded_batch * ncp * 4
    )

    out = pl.pallas_call(
        mlp_kernel,
        out_shape=jax.ShapeDtypeStruct((padded_batch, ncp), jnp.float32),
        grid=grid,
        in_specs=[
            pl.BlockSpec((tm, in_features), lambda i: (i, 0)),
            resident(w1p), resident(b1p),
            resident(w2p), resident(b2p),
            resident(w3p), resident(b3p),
        ],
        out_specs=pl.BlockSpec((tm, ncp), lambda i: (i, 0)),
        compiler_params=pltpu.CompilerParams(
            dimension_semantics=("parallel",),
            vmem_limit_bytes=48 * 1024 * 1024,
        ),
        cost_estimate=pl.CostEstimate(
            flops=flops, transcendentals=0, bytes_accessed=bytes_accessed),
    )(xp, w1p, b1p, w2p, b2p, w3p, b3p)

    # Strip batch padding and the zero-padded class columns.
    return out[:batch, :num_classes]


def init_linear(key, fan_in, fan_out):
    # Mirrors PyTorch nn.Linear default: U(-1/sqrt(fan_in), 1/sqrt(fan_in)).
    kw, kb = jax.random.split(key)
    bound = 1.0 / (fan_in ** 0.5)
    w = jax.random.uniform(kw, (fan_in, fan_out), jnp.float32, -bound, bound)
    b = jax.random.uniform(kb, (1, fan_out), jnp.float32, -bound, bound)
    return w, b


if __name__ == "__main__":
    input_size = 784
    num_classes = 10
    batch = 8

    key = jax.random.PRNGKey(0)
    kx, k1, k2, k3 = jax.random.split(key, 4)

    x = jax.random.normal(kx, (batch, input_size), jnp.float32)
    w1, b1 = init_linear(k1, input_size, 500)
    w2, b2 = init_linear(k2, 500, 100)
    w3, b3 = init_linear(k3, 100, num_classes)

    out = nn_forward(x, w1, b1, w2, b2, w3, b3)
    jax.block_until_ready(out)

    # Sanity check against plain f32 JAX reference (bf16 matmul inputs ->
    # loosened tolerance).
    ref = jnp.maximum(x @ w1 + b1, 0.0)
    ref = jnp.maximum(ref @ w2 + b2, 0.0)
    ref = ref @ w3 + b3
    assert out.shape == (batch, num_classes)
    assert jnp.allclose(out, ref, atol=2e-2, rtol=2e-2), (
        float(jnp.max(jnp.abs(out - ref))))

    print("KERNEL_OK")
</pallas_src>

<mosaic_0001>
module attributes {stable_mosaic.version = 11 : i64} {
  func.func @mlp_kernel(%arg0: i32, %arg1: memref<8x784xbf16, #tpu.memory_space<vmem>>, %arg2: memref<784x512xbf16, #tpu.memory_space<vmem>>, %arg3: memref<1x512xf32, #tpu.memory_space<vmem>>, %arg4: memref<512x128xbf16, #tpu.memory_space<vmem>>, %arg5: memref<1x128xf32, #tpu.memory_space<vmem>>, %arg6: memref<128x128xbf16, #tpu.memory_space<vmem>>, %arg7: memref<1x128xf32, #tpu.memory_space<vmem>>, %arg8: memref<8x128xf32, #tpu.memory_space<vmem>>) attributes {dimension_semantics = [#tpu.dimension_semantics<parallel>], iteration_bounds = array<i64: 1>, scalar_prefetch = 0 : i64, scratch_operands = 0 : i64, tpu.core_type = #tpu.core_type<tc>, window_params = [{transform_indices = @transform_0, window_bounds = array<i64: 8, 784>}, {pipeline_mode = #tpu.pipeline_mode<synchronous>, transform_indices = @transform_1, window_bounds = array<i64: 784, 512>}, {pipeline_mode = #tpu.pipeline_mode<synchronous>, transform_indices = @transform_2, window_bounds = array<i64: 1, 512>}, {pipeline_mode = #tpu.pipeline_mode<synchronous>, transform_indices = @transform_3, window_bounds = array<i64: 512, 128>}, {pipeline_mode = #tpu.pipeline_mode<synchronous>, transform_indices = @transform_4, window_bounds = array<i64: 1, 128>}, {pipeline_mode = #tpu.pipeline_mode<synchronous>, transform_indices = @transform_5, window_bounds = array<i64: 128, 128>}, {pipeline_mode = #tpu.pipeline_mode<synchronous>, transform_indices = @transform_6, window_bounds = array<i64: 1, 128>}, {transform_indices = @transform_7, window_bounds = array<i64: 8, 128>}]} {
    %c0 = arith.constant 0 : index
    %c0_0 = arith.constant 0 : index
    %0 = vector.load %arg1[%c0, %c0_0] : memref<8x784xbf16, #tpu.memory_space<vmem>>, vector<8x784xbf16>
    %c0_1 = arith.constant 0 : index
    %c0_2 = arith.constant 0 : index
    %1 = vector.load %arg2[%c0_1, %c0_2] : memref<784x512xbf16, #tpu.memory_space<vmem>>, vector<784x512xbf16>
    %cst = arith.constant dense<0.000000e+00> : vector<8x512xf32>
    %2 = tpu.matmul %0, %1, %cst {dimension_numbers = #tpu.dot_dimension_numbers<[1], [0], [0], [1], [0, 0, 1, 1], [], []>} : vector<8x784xbf16>, vector<784x512xbf16>, vector<8x512xf32> -> vector<8x512xf32>
    %c0_3 = arith.constant 0 : index
    %c0_4 = arith.constant 0 : index
    %3 = vector.load %arg3[%c0_3, %c0_4] : memref<1x512xf32, #tpu.memory_space<vmem>>, vector<1x512xf32>
    %4 = vector.broadcast %3 : vector<1x512xf32> to vector<8x512xf32>
    %5 = arith.addf %2, %4 : vector<8x512xf32>
    %cst_5 = arith.constant 0.000000e+00 : f32
    %6 = vector.broadcast %cst_5 : f32 to vector<8x512xf32>
    %7 = arith.maximumf %5, %6 : vector<8x512xf32>
    %8 = arith.truncf %7 : vector<8x512xf32> to vector<8x512xbf16>
    %c0_6 = arith.constant 0 : index
    %c0_7 = arith.constant 0 : index
    %9 = vector.load %arg4[%c0_6, %c0_7] : memref<512x128xbf16, #tpu.memory_space<vmem>>, vector<512x128xbf16>
    %cst_8 = arith.constant dense<0.000000e+00> : vector<8x128xf32>
    %10 = tpu.matmul %8, %9, %cst_8 {dimension_numbers = #tpu.dot_dimension_numbers<[1], [0], [0], [1], [0, 0, 1, 1], [], []>} : vector<8x512xbf16>, vector<512x128xbf16>, vector<8x128xf32> -> vector<8x128xf32>
    %c0_9 = arith.constant 0 : index
    %c0_10 = arith.constant 0 : index
    %11 = vector.load %arg5[%c0_9, %c0_10] : memref<1x128xf32, #tpu.memory_space<vmem>>, vector<1x128xf32>
    %12 = vector.broadcast %11 : vector<1x128xf32> to vector<8x128xf32>
    %13 = arith.addf %10, %12 : vector<8x128xf32>
    %cst_11 = arith.constant 0.000000e+00 : f32
    %14 = vector.broadcast %cst_11 : f32 to vector<8x128xf32>
    %15 = arith.maximumf %13, %14 : vector<8x128xf32>
    %16 = arith.truncf %15 : vector<8x128xf32> to vector<8x128xbf16>
    %c0_12 = arith.constant 0 : index
    %c0_13 = arith.constant 0 : index
    %17 = vector.load %arg6[%c0_12, %c0_13] : memref<128x128xbf16, #tpu.memory_space<vmem>>, vector<128x128xbf16>
    %cst_14 = arith.constant dense<0.000000e+00> : vector<8x128xf32>
    %18 = tpu.matmul %16, %17, %cst_14 {dimension_numbers = #tpu.dot_dimension_numbers<[1], [0], [0], [1], [0, 0, 1, 1], [], []>} : vector<8x128xbf16>, vector<128x128xbf16>, vector<8x128xf32> -> vector<8x128xf32>
    %c0_15 = arith.constant 0 : index
    %c0_16 = arith.constant 0 : index
    %19 = vector.load %arg7[%c0_15, %c0_16] : memref<1x128xf32, #tpu.memory_space<vmem>>, vector<1x128xf32>
    %20 = vector.broadcast %19 : vector<1x128xf32> to vector<8x128xf32>
    %21 = arith.addf %18, %20 : vector<8x128xf32>
    %c0_17 = arith.constant 0 : index
    %c0_18 = arith.constant 0 : index
    %22 = vector.load %arg8[%c0_17, %c0_18] : memref<8x128xf32, #tpu.memory_space<vmem>>, vector<8x128xf32>
    tpu.vector_store %arg8[%c0_17, %c0_18], %21 {strides = array<i32>} : memref<8x128xf32, #tpu.memory_space<vmem>>, vector<8x128xf32>,
    return
  }
  func.func @transform_0(%arg0: i32) -> (i32, i32) {
    %c0_i32 = arith.constant 0 : i32
    %c0_i32_0 = arith.constant 0 : i32
    return %arg0, %c0_i32 : i32, i32
  }
  func.func @transform_1(%arg0: i32) -> (i32, i32) {
    %c0_i32 = arith.constant 0 : i32
    %c0_i32_0 = arith.constant 0 : i32
    %c0_i32_1 = arith.constant 0 : i32
    return %c0_i32, %c0_i32_0 : i32, i32
  }
  func.func @transform_2(%arg0: i32) -> (i32, i32) {
    %c0_i32 = arith.constant 0 : i32
    %c0_i32_0 = arith.constant 0 : i32
    %c0_i32_1 = arith.constant 0 : i32
    return %c0_i32, %c0_i32_0 : i32, i32
  }
  func.func @transform_3(%arg0: i32) -> (i32, i32) {
    %c0_i32 = arith.constant 0 : i32
    %c0_i32_0 = arith.constant 0 : i32
    %c0_i32_1 = arith.constant 0 : i32
    return %c0_i32, %c0_i32_0 : i32, i32
  }
  func.func @transform_4(%arg0: i32) -> (i32, i32) {
    %c0_i32 = arith.constant 0 : i32
    %c0_i32_0 = arith.constant 0 : i32
    %c0_i32_1 = arith.constant 0 : i32
    return %c0_i32, %c0_i32_0 : i32, i32
  }
  func.func @transform_5(%arg0: i32) -> (i32, i32) {
    %c0_i32 = arith.constant 0 : i32
    %c0_i32_0 = arith.constant 0 : i32
    %c0_i32_1 = arith.constant 0 : i32
    return %c0_i32, %c0_i32_0 : i32, i32
  }
  func.func @transform_6(%arg0: i32) -> (i32, i32) {
    %c0_i32 = arith.constant 0 : i32
    %c0_i32_0 = arith.constant 0 : i32
    %c0_i32_1 = arith.constant 0 : i32
    return %c0_i32, %c0_i32_0 : i32, i32
  }
  func.func @transform_7(%arg0: i32) -> (i32, i32) {
    %c0_i32 = arith.constant 0 : i32
    %c0_i32_0 = arith.constant 0 : i32
    return %arg0, %c0_i32 : i32, i32
  }
}

</mosaic_0001>

<bundles_post_ra>
// kernel: tpu_custom_call.1
= control target key start
LH: loop header
LB: loop body
LE: loop exit
PB: predicated region body
PF: predicated region fallthrough
CT: control target
= control target key end

     0   :  { %12 = vsyncpa [#allocation3], 0  ;;  %s3085_s0 = inlined_call_operand.hbm [shape: bf16[8,784], index: 0, kind: input, shape index: {}]   ;;  %s3086_s1 = inlined_call_operand.hbm [shape: bf16[784,512], index: 1, kind: input, shape index: {}]   ;;  %s3087_s2 = inlined_call_operand.vmem [shape: f32[1,512], index: 2, kind: input, shape index: {}]   ;;  %s3088_s3 = inlined_call_operand.hbm [shape: bf16[512,128], index: 3, kind: input, shape index: {}]   ;;  %s3089_s4 = inlined_call_operand.vmem [shape: f32[1,128], index: 4, kind: input, shape index: {}]   ;;  %s3090_s5 = inlined_call_operand.hbm [shape: bf16[128,128], index: 5, kind: input, shape index: {}]   ;;  %s3091_s6 = inlined_call_operand.vmem [shape: f32[1,128], index: 6, kind: input, shape index: {}]   ;;  %s3092_s7 = inlined_call_operand.hbm [shape: f32[8,128], index: 7, kind: output, shape index: {}]  }
   0x1   :  { %13 = vsyncpa [#allocation6], 0 }
   0x2   :  { %14 = vsyncpa [#allocation9], 0 }
   0x3   :  { %15 = vsyncpa [#allocation4], 0  ;;  %s2939_s24 = smov [#allocation5]   ;;  %s2821_s28 = scalar_lea.hbm %s3086_s1, 25088 }
   0x4   :  { %s31_s25 = sshll.u32 %s2939_s24, 4  ;;  %p2822_p0 = scmp.ne.s32.totalorder %s3086_s1, %s2821_s28  ;;  %s32_s25 = int_to_ptr.vmem [resolvable:$true] %s31_s25 }
   0x5   :  { %p2825_p1 = scmp.lt.u32.totalorder %s2821_s28, %s3086_s1 }
   0x7   :  { %p2827_p2 = pnand %p2825_p1, %p2822_p0 }
   0x9   :  { %2830 = shalt.err (!%p2827_p2)
}
   0xa   :  { %s2831_s10 = scalar_lea.vmem %s32_s25, 25088  ;;  %p2836_p4 = scmp.lt.s32.totalorder %s32_s25, %s32_s25 }
   0xb   :  { %p2832_p3 = scmp.ne.s32.totalorder %s32_s25, %s2831_s10  ;;  %p2837_p5 = scmp.lt.s32.totalorder %s2831_s10, %s2831_s10 }
   0xd   :  { %p2838_p6 = por %p2837_p5, %p2836_p4 }
   0xf   :  { %p2839_p7 = pnand %p2838_p6, %p2832_p3 }
  0x11   :  { %2842 = shalt.err (!%p2839_p7)
}
  0x12   :  { %s2940_s11 = smov 256   ;;  %s2941_s12 = smov 16  }
  0x13   :  { %37 = dma.hbm_to_vmem [thread:$0]  %s3086_s1, 25088, %s32_s25, [#allocation6], %s2940_s11, %s2940_s11, %s2941_s12  }
  0x14   :  { %s2942_s15 = smov [#allocation2]   ;;  %s2943_s17 = smov [#allocation7]  }
  0x15   :  { %s22_s16 = sshll.u32 %s2942_s15, 4  ;;  %s45_s18 = sshll.u32 %s2943_s17, 4  ;;  %s23_s16 = int_to_ptr.vmem [resolvable:$true] %s22_s16  ;;  %s46_s18 = int_to_ptr.vmem [resolvable:$true] %s45_s18 }
  0x16   :  { %s2843_s21 = scalar_lea.hbm %s3085_s0, 448 }
  0x17   :  { %p2844_p8 = scmp.ne.s32.totalorder %s3085_s0, %s2843_s21  ;;  %p2847_p9 = scmp.lt.u32.totalorder %s2843_s21, %s3085_s0 }
  0x19   :  { %p2849_p10 = pnand %p2847_p9, %p2844_p8 }
  0x1b   :  { %2852 = shalt.err (!%p2849_p10)
}
  0x1c   :  { %s2853_s1 = scalar_lea.vmem %s23_s16, 448  ;;  %p2858_p12 = scmp.lt.s32.totalorder %s23_s16, %s23_s16 }
  0x1d   :  { %p2854_p11 = scmp.ne.s32.totalorder %s23_s16, %s2853_s1  ;;  %p2859_p13 = scmp.lt.s32.totalorder %s2853_s1, %s2853_s1 }
  0x1f   :  { %p2860_p0 = por %p2859_p13, %p2858_p12 }
  0x21   :  { %p2861_p1 = pnand %p2860_p0, %p2854_p11 }
  0x23   :  { %2864 = shalt.err (!%p2861_p1)
}
  0x24   :  { %25 = dma.hbm_to_vmem [thread:$0]  %s3085_s0, 448, %s23_s16, [#allocation3]  }
  0x25   :  { %s2865_s30 = scalar_lea.hbm %s3088_s3, 4096 }
  0x26   :  { %p2866_p2 = scmp.ne.s32.totalorder %s3088_s3, %s2865_s30  ;;  %p2869_p3 = scmp.lt.u32.totalorder %s2865_s30, %s3088_s3 }
  0x28   :  { %p2871_p4 = pnand %p2869_p3, %p2866_p2 }
  0x2a   :  { %2874 = shalt.err (!%p2871_p4)
}
  0x2b   :  { %s2875_s12 = scalar_lea.vmem %s46_s18, 4096  ;;  %p2880_p6 = scmp.lt.s32.totalorder %s46_s18, %s46_s18 }
  0x2c   :  { %p2876_p5 = scmp.ne.s32.totalorder %s46_s18, %s2875_s12  ;;  %p2881_p7 = scmp.lt.s32.totalorder %s2875_s12, %s2875_s12 }
  0x2e   :  { %p2882_p8 = por %p2881_p7, %p2880_p6 }
  0x30   :  { %p2883_p9 = pnand %p2882_p8, %p2876_p5 }
  0x32   :  { %2886 = shalt.err (!%p2883_p9)
}
  0x33   :  { %s2944_s0 = smov 64   ;;  %s2945_s13 = smov 4  }
  0x34   :  { %51 = dma.hbm_to_vmem [thread:$0]  %s3088_s3, 4096, %s46_s18, [#allocation6], %s2944_s0, %s2944_s0, %s2945_s13  }
  0x35   :  { %s2946_s16 = smov [#allocation8]   ;;  %s2887_s21 = scalar_lea.hbm %s3090_s5, 1024 }
  0x36   :  { %s59_s17 = sshll.u32 %s2946_s16, 4  ;;  %p2888_p10 = scmp.ne.s32.totalorder %s3090_s5, %s2887_s21  ;;  %s60_s17 = int_to_ptr.vmem [resolvable:$true] %s59_s17 }
  0x37   :  { %p2891_p11 = scmp.lt.u32.totalorder %s2887_s21, %s3090_s5 }
  0x39   :  { %p2893_p12 = pnand %p2891_p11, %p2888_p10 }
  0x3b   :  { %2896 = shalt.err (!%p2893_p12)
}
  0x3c   :  { %s2897_s1 = scalar_lea.vmem %s60_s17, 1024  ;;  %p2902_p0 = scmp.lt.s32.totalorder %s60_s17, %s60_s17 }
  0x3d   :  { %p2898_p13 = scmp.ne.s32.totalorder %s60_s17, %s2897_s1  ;;  %p2903_p1 = scmp.lt.s32.totalorder %s2897_s1, %s2897_s1 }
  0x3f   :  { %p2904_p2 = por %p2903_p1, %p2902_p0 }
  0x41   :  { %p2905_p3 = pnand %p2904_p2, %p2898_p13 }
  0x43   :  { %2908 = shalt.err (!%p2905_p3)
}
  0x44   :  { %65 = dma.hbm_to_vmem [thread:$0]  %s3090_s5, 1024, %s60_s17, [#allocation9], %s2944_s0, %s2944_s0, %s2945_s13  }
  0x45   :  { %2931 = dma.done.wait [#allocation3], 448  }
  0x46   :  { %2932 = vsyncadd [#allocation3], 4294966848 }
  0x47   :  { %2933 = dma.done.wait [#allocation6], 29184  }
  0x48   :  { %2934 = vsyncadd [#allocation6], 4294938112 }
  0x49   :  { %2935 = dma.done.wait [#allocation9], 1024  }
  0x4a   :  { %2936 = vsyncadd [#allocation9], 4294966272  ;;  %v2947_v0 = vmov 0   ;;  %v2479_v1 = vld [vmem:[#allocation5 + $0x4] ss:$16 sps:$4 sm:$0xff]   ;;  %vm1307_vm0 = vcmask 130048  }
  0x4b   :  { %1466 = vmatprep.mubr.bf16.mxu1 %v2947_v0  ;;  %v2481_v2 = vld [vmem:[#allocation5 + $0x604] ss:$16 sps:$4 sm:$0xff]   ;;  %1311 = vmatprep.subr.bf16.mxu0 %v2479_v1  ;;  %v2483_v3 = vld [vmem:[#allocation5] ss:$16 sps:$4 sm:$0xff]   ;;  %v2487_v6 = vld [vmem:[#allocation2 + $0x18] ss:$0 sps:$4 sm:$0xff]  }
  0x4c   :  { %v2484_v4 = vld [vmem:[#allocation5 + $0x600] ss:$16 sps:$4 sm:$0xff]   ;;  %1434 = vmatprep.subr.bf16.mxu1 %v2481_v2  ;;  %v2485_v5 = vld [vmem:[#allocation5 + $0x24] ss:$16 sps:$4 sm:$0xff]   ;;  %1312 = vmatpush1.bf16.msra.mxu0 %v2483_v3  ;;  %v2488_v7 = vld [vmem:[#allocation5 + $0x8] ss:$16 sps:$4 sm:$0xff]  }
  0x4d   :  { %1435 = vmatpush1.bf16.msra.mxu1 %v2484_v4  ;;  %1313 = vmatprep.subr.bf16.mxu0 %v2485_v5  ;;  %v2490_v8 = vld [vmem:[#allocation5 + $0xc] ss:$16 sps:$4 sm:$0xff]   ;;  %v2491_v9 = vld [vmem:[#allocation5 + $0x20] ss:$16 sps:$4 sm:$0xff]   ;;  %v2492_v10 = vld [vmem:[#allocation5 + $0x44] ss:$16 sps:$4 sm:$0xff]  }
  0x4e   :  { %1475 = vmatprep.subr.bf16.mxu1 %v2490_v8  ;;  %v2494_v11 = vld [vmem:[#allocation5 + $0x28] ss:$16 sps:$4 sm:$0xff]   ;;  %v2496_v12 = vld [vmem:[#allocation5 + $0x2c] ss:$16 sps:$4 sm:$0xff]   ;;  %v2497_v13 = vld [vmem:[#allocation5 + $0x40] ss:$16 sps:$4 sm:$0xff]  }
  0x4f   :  { %v2498_v14 = vld [vmem:[#allocation5 + $0x64] ss:$16 sps:$4 sm:$0xff]   ;;  %v2502_v15 = vld [vmem:[#allocation5 + $0x4c] ss:$16 sps:$4 sm:$0xff]   ;;  %v2500_v16 = vld [vmem:[#allocation5 + $0x48] ss:$16 sps:$4 sm:$0xff]  }
  0x50   :  { %2324 = vmatmul.mubr.msk.bf16.vlgmr.msra.gmra.mrb[0].mxu1 %vm1307_vm0, %v2487_v6  ;;  %1314 = vmatpush1.bf16.msra.mxu0 %v2491_v9  ;;  %v2503_v17 = vld [vmem:[#allocation5 + $0x60] ss:$16 sps:$4 sm:$0xff]   ;;  %v2504_v18 = vld [vmem:[#allocation5 + $0x84] ss:$16 sps:$4 sm:$0xff]   ;;  %v2508_v19 = vld [vmem:[#allocation5 + $0x6c] ss:$16 sps:$4 sm:$0xff]  }
  0x51   :  { %1476 = vmatpush1.bf16.msra.mxu1 %v2488_v7  ;;  %1315 = vmatprep.subr.bf16.mxu0 %v2492_v10  ;;  %v2506_v20 = vld [vmem:[#allocation5 + $0x68] ss:$16 sps:$4 sm:$0xff]   ;;  %v2509_v21 = vld [vmem:[#allocation5 + $0x80] ss:$16 sps:$4 sm:$0xff]   ;;  %v2510_v22 = vld [vmem:[#allocation5 + $0xa4] ss:$16 sps:$4 sm:$0xff]  }
  0x52   :  { %1477 = vmatprep.subr.bf16.mxu1 %v2496_v12  ;;  %v2514_v23 = vld [vmem:[#allocation5 + $0x8c] ss:$16 sps:$4 sm:$0xff]   ;;  %v2512_v24 = vld [vmem:[#allocation5 + $0x88] ss:$16 sps:$4 sm:$0xff]   ;;  %v2515_v25 = vld [vmem:[#allocation5 + $0xa0] ss:$16 sps:$4 sm:$0xff]  }
  0x53   :  { %v2516_v26 = vld [vmem:[#allocation5 + $0xc4] ss:$16 sps:$4 sm:$0xff]   ;;  %v2520_v27 = vld [vmem:[#allocation5 + $0xac] ss:$16 sps:$4 sm:$0xff]   ;;  %v2518_v28 = vld [vmem:[#allocation5 + $0xa8] ss:$16 sps:$4 sm:$0xff]  }
  0x54   :  { %1316 = vmatpush1.bf16.msra.mxu0 %v2497_v13  ;;  %v2521_v29 = vld [vmem:[#allocation5 + $0xc0] ss:$16 sps:$4 sm:$0xff]   ;;  %v2522_v30 = vld [vmem:[#allocation5 + $0xe4] ss:$16 sps:$4 sm:$0xff]   ;;  %v2526_v31 = vld [vmem:[#allocation5 + $0xcc] ss:$16 sps:$4 sm:$0xff]  }
  0x55   :  { %1478 = vmatpush1.bf16.msra.mxu1 %v2494_v11  ;;  %1317 = vmatprep.subr.bf16.mxu0 %v2498_v14  ;;  %v2524_v32 = vld [vmem:[#allocation5 + $0xc8] ss:$16 sps:$4 sm:$0xff]   ;;  %v2527_v33 = vld [vmem:[#allocation5 + $0xe0] ss:$16 sps:$4 sm:$0xff]   ;;  %v2528_v34 = vld [vmem:[#allocation5 + $0x104] ss:$16 sps:$4 sm:$0xff]  }
  0x56   :  { %1479 = vmatprep.subr.bf16.mxu1 %v2502_v15  ;;  %v2532_v35 = vld [vmem:[#allocation5 + $0xec] ss:$16 sps:$4 sm:$0xff]   ;;  %v2530_v36 = vld [vmem:[#allocation5 + $0xe8] ss:$16 sps:$4 sm:$0xff]   ;;  %v2533_v37 = vld [vmem:[#allocation5 + $0x100] ss:$16 sps:$4 sm:$0xff]  }
  0x57   :  { %v2534_v38 = vld [vmem:[#allocation5 + $0x124] ss:$16 sps:$4 sm:$0xff]   ;;  %v2538_v39 = vld [vmem:[#allocation5 + $0x10c] ss:$16 sps:$4 sm:$0xff]   ;;  %v2536_v40 = vld [vmem:[#allocation5 + $0x108] ss:$16 sps:$4 sm:$0xff]  }
  0x58   :  { %1318 = vmatpush1.bf16.msra.mxu0 %v2503_v17  ;;  %v2539_v41 = vld [vmem:[#allocation5 + $0x120] ss:$16 sps:$4 sm:$0xff]   ;;  %v2540_v42 = vld [vmem:[#allocation5 + $0x144] ss:$16 sps:$4 sm:$0xff]   ;;  %v2544_v43 = vld [vmem:[#allocation5 + $0x12c] ss:$16 sps:$4 sm:$0xff]  }
  0x59   :  { %1480 = vmatpush1.bf16.msra.mxu1 %v2500_v16  ;;  %1319 = vmatprep.subr.bf16.mxu0 %v2504_v18  ;;  %v2542_v44 = vld [vmem:[#allocation5 + $0x128] ss:$16 sps:$4 sm:$0xff]   ;;  %v2545_v45 = vld [vmem:[#allocation5 + $0x140] ss:$16 sps:$4 sm:$0xff]   ;;  %v2546_v46 = vld [vmem:[#allocation5 + $0x164] ss:$16 sps:$4 sm:$0xff]  }
  0x5a   :  { %1481 = vmatprep.subr.bf16.mxu1 %v2508_v19  ;;  %v2550_v47 = vld [vmem:[#allocation5 + $0x14c] ss:$16 sps:$4 sm:$0xff]   ;;  %v2548_v48 = vld [vmem:[#allocation5 + $0x148] ss:$16 sps:$4 sm:$0xff]   ;;  %v2551_v50 = vld [vmem:[#allocation5 + $0x160] ss:$16 sps:$4 sm:$0xff]  }
  0x5b   :  { %v81_v49 = vld [vmem:[#allocation2] sm:$0xff]  ;;  %v2556_v53 = vld [vmem:[#allocation5 + $0x16c] ss:$16 sps:$4 sm:$0xff]   ;;  %v2557_v55 = vld [vmem:[#allocation5 + $0x180] ss:$16 sps:$4 sm:$0xff]   ;;  %vm2949_vm1 = vmmov 0  }
  0x5c   :  { %1320 = vmatpush1.bf16.msra.mxu0 %v2509_v21  ;;  %v2552_v51 = vld [vmem:[#allocation5 + $0x184] ss:$16 sps:$4 sm:$0xff]   ;;  %v2122_v52 = vcombine.high %v81_v49, %v81_v49  ;;  %v2554_v54 = vld [vmem:[#allocation5 + $0x168] ss:$16 sps:$4 sm:$0xff]   ;;  %v2562_v57 = vld [vmem:[#allocation5 + $0x18c] ss:$16 sps:$4 sm:$0xff]   ;;  %v2121_v7 = vcombine.low %v81_v49, %v81_v49 }
  0x5d   :  { %1482 = vmatpush1.bf16.msra.mxu1 %v2506_v20  ;;  %1321 = vmatprep.subr.bf16.mxu0 %v2510_v22  ;;  %v2558_v56 = vld [vmem:[#allocation5 + $0x1a4] ss:$16 sps:$4 sm:$0xff]   ;;  %v2560_v58 = vld [vmem:[#allocation5 + $0x188] ss:$16 sps:$4 sm:$0xff]   ;;  %v2563_v59 = vld [vmem:[#allocation5 + $0x1a0] ss:$16 sps:$4 sm:$0xff]  }
  0x5e   :  { %1483 = vmatprep.subr.bf16.mxu1 %v2514_v23  ;;  %1343 = vmatprep.mubr.bf16.mxu0 %v2122_v52  ;;  %v2564_v60 = vld [vmem:[#allocation5 + $0x1c4] ss:$16 sps:$4 sm:$0xff]   ;;  %v2568_v61 = vld [vmem:[#allocation5 + $0x1ac] ss:$16 sps:$4 sm:$0xff]   ;;  %v2566_v62 = vld [vmem:[#allocation5 + $0x1a8] ss:$16 sps:$4 sm:$0xff]  }
  0x5f   :  { %1507 = vmatprep.mubr.bf16.mxu1 %v2122_v52  ;;  %v2569_v63 = vld [vmem:[#allocation5 + $0x1c0] ss:$16 sps:$4 sm:$0xff]   ;;  %v2570_v1 = vld [vmem:[#allocation5 + $0x1e4] ss:$16 sps:$4 sm:$0xff]   ;;  %v2574_v2 = vld [vmem:[#allocation5 + $0x1cc] ss:$16 sps:$4 sm:$0xff]  }
  0x60   :  { %1322 = vmatpush1.bf16.msra.mxu0 %v2515_v25  ;;  %v2572_v3 = vld [vmem:[#allocation5 + $0x1c8] ss:$16 sps:$4 sm:$0xff]   ;;  %v2575_v4 = vld [vmem:[#allocation5 + $0x1e0] ss:$16 sps:$4 sm:$0xff]   ;;  %v2580_v5 = vld [vmem:[#allocation5 + $0x204] ss:$16 sps:$4 sm:$0xff]  }
  0x61   :  { %1484 = vmatpush1.bf16.msra.mxu1 %v2512_v24  ;;  %1323 = vmatprep.subr.bf16.mxu0 %v2516_v26  ;;  %v2583_v6 = vld [vmem:[#allocation5 + $0x1ec] ss:$16 sps:$4 sm:$0xff]   ;;  %v2578_v8 = vld [vmem:[#allocation5 + $0x200] ss:$16 sps:$4 sm:$0xff]   ;;  %v2581_v9 = vld [vmem:[#allocation5 + $0x1e8] ss:$16 sps:$4 sm:$0xff]  }
  0x62   :  { %1485 = vmatprep.subr.bf16.mxu1 %v2520_v27  ;;  %v2586_v10 = vld [vmem:[#allocation5 + $0x224] ss:$16 sps:$4 sm:$0xff]   ;;  %v2589_v11 = vld [vmem:[#allocation5 + $0x20c] ss:$16 sps:$4 sm:$0xff]   ;;  %v2584_v12 = vld [vmem:[#allocation5 + $0x220] ss:$16 sps:$4 sm:$0xff]  }
  0x63   :  { %v2587_v13 = vld [vmem:[#allocation5 + $0x208] ss:$16 sps:$4 sm:$0xff]   ;;  %v2592_v14 = vld [vmem:[#allocation5 + $0x244] ss:$16 sps:$4 sm:$0xff]   ;;  %v2595_v15 = vld [vmem:[#allocation5 + $0x22c] ss:$16 sps:$4 sm:$0xff]  }
  0x64   :  { %1324 = vmatpush1.bf16.msra.mxu0 %v2521_v29  ;;  %v2590_v16 = vld [vmem:[#allocation5 + $0x240] ss:$16 sps:$4 sm:$0xff]   ;;  %v2593_v17 = vld [vmem:[#allocation5 + $0x228] ss:$16 sps:$4 sm:$0xff]   ;;  %v2598_v18 = vld [vmem:[#allocation5 + $0x264] ss:$16 sps:$4 sm:$0xff]  }
  0x65   :  { %1486 = vmatpush1.bf16.msra.mxu1 %v2518_v28  ;;  %1325 = vmatprep.subr.bf16.mxu0 %v2522_v30  ;;  %v2601_v19 = vld [vmem:[#allocation5 + $0x24c] ss:$16 sps:$4 sm:$0xff]   ;;  %v2596_v20 = vld [vmem:[#allocation5 + $0x260] ss:$16 sps:$4 sm:$0xff]   ;;  %v2599_v21 = vld [vmem:[#allocation5 + $0x248] ss:$16 sps:$4 sm:$0xff]  }
  0x66   :  { %1487 = vmatprep.subr.bf16.mxu1 %v2526_v31  ;;  %v2604_v22 = vld [vmem:[#allocation5 + $0x284] ss:$16 sps:$4 sm:$0xff]   ;;  %v2607_v23 = vld [vmem:[#allocation5 + $0x26c] ss:$16 sps:$4 sm:$0xff]   ;;  %v2602_v24 = vld [vmem:[#allocation5 + $0x280] ss:$16 sps:$4 sm:$0xff]  }
  0x67   :  { %v2605_v25 = vld [vmem:[#allocation5 + $0x268] ss:$16 sps:$4 sm:$0xff]   ;;  %v2610_v26 = vld [vmem:[#allocation5 + $0x2a4] ss:$16 sps:$4 sm:$0xff]   ;;  %v2613_v27 = vld [vmem:[#allocation5 + $0x28c] ss:$16 sps:$4 sm:$0xff]  }
  0x68   :  { %1326 = vmatpush1.bf16.msra.mxu0 %v2527_v33  ;;  %v2608_v28 = vld [vmem:[#allocation5 + $0x2a0] ss:$16 sps:$4 sm:$0xff]   ;;  %v2611_v29 = vld [vmem:[#allocation5 + $0x288] ss:$16 sps:$4 sm:$0xff]   ;;  %v2616_v30 = vld [vmem:[#allocation5 + $0x2c4] ss:$16 sps:$4 sm:$0xff]  }
  0x69   :  { %1488 = vmatpush1.bf16.msra.mxu1 %v2524_v32  ;;  %1327 = vmatprep.subr.bf16.mxu0 %v2528_v34  ;;  %v2619_v31 = vld [vmem:[#allocation5 + $0x2ac] ss:$16 sps:$4 sm:$0xff]   ;;  %v2614_v33 = vld [vmem:[#allocation5 + $0x2c0] ss:$16 sps:$4 sm:$0xff]   ;;  %v2617_v34 = vld [vmem:[#allocation5 + $0x2a8] ss:$16 sps:$4 sm:$0xff]  }
  0x6a   :  { %1489 = vmatprep.subr.bf16.mxu1 %v2532_v35  ;;  %v3041_v32 = vld [vmem:[#allocation2 + $0x8] sm:$0xff]  ;;  %v2646_v52 = vld [vmem:[#allocation5 + $0x364] ss:$16 sps:$4 sm:$0xff]   ;;  %s2950_s30 = smov [#allocation10]  }
  0x6b   :  { %v2124_v35 = vcombine.high %v3041_v32, %v3041_v32  ;;  %v2643_v49 = vld [vmem:[#allocation5 + $0x32c] ss:$16 sps:$4 sm:$0xff]   ;;  %s2110_s8 = sshll.u32 %s2950_s30, 4  ;;  %s2111_s8 = int_to_ptr.vmem [resolvable:$true] %s2110_s8 }
  0x6c   :  { %1328 = vmatpush1.bf16.msra.mxu0 %v2533_v37  ;;  %v2625_v37 = vld [vmem:[#allocation5 + $0x2cc] ss:$16 sps:$4 sm:$0xff]   ;;  %p2914_p5 = scmp.lt.s32.totalorder %s2111_s8, %s2111_s8 }
  0x6d   :  { %1490 = vmatpush1.bf16.msra.mxu1 %v2530_v36  ;;  %1329 = vmatprep.subr.bf16.mxu0 %v2534_v38  ;;  %v2622_v36 = vld [vmem:[#allocation5 + $0x2e4] ss:$16 sps:$4 sm:$0xff]   ;;  %v2620_v38 = vld [vmem:[#allocation5 + $0x2e0] ss:$16 sps:$4 sm:$0xff]  }
  0x6e   :  { %1491 = vmatprep.subr.bf16.mxu1 %v2538_v39  ;;  %v2623_v39 = vld [vmem:[#allocation5 + $0x2c8] ss:$16 sps:$4 sm:$0xff]  }
  0x70   :  { %1330 = vmatpush1.bf16.msra.mxu0 %v2539_v41  ;;  %v2631_v41 = vld [vmem:[#allocation5 + $0x2ec] ss:$16 sps:$4 sm:$0xff]  }
  0x71   :  { %1492 = vmatpush1.bf16.msra.mxu1 %v2536_v40  ;;  %1331 = vmatprep.subr.bf16.mxu0 %v2540_v42  ;;  %v2628_v40 = vld [vmem:[#allocation5 + $0x304] ss:$16 sps:$4 sm:$0xff]   ;;  %v2626_v42 = vld [vmem:[#allocation5 + $0x300] ss:$16 sps:$4 sm:$0xff]  }
  0x72   :  { %1493 = vmatprep.subr.bf16.mxu1 %v2544_v43  ;;  %v2629_v43 = vld [vmem:[#allocation5 + $0x2e8] ss:$16 sps:$4 sm:$0xff]  }
  0x74   :  { %1332 = vmatpush1.bf16.msra.mxu0 %v2545_v45  ;;  %v2637_v45 = vld [vmem:[#allocation5 + $0x30c] ss:$16 sps:$4 sm:$0xff]  }
  0x75   :  { %1494 = vmatpush1.bf16.msra.mxu1 %v2542_v44  ;;  %1333 = vmatprep.subr.bf16.mxu0 %v2546_v46  ;;  %v2634_v44 = vld [vmem:[#allocation5 + $0x324] ss:$16 sps:$4 sm:$0xff]   ;;  %v2632_v46 = vld [vmem:[#allocation5 + $0x320] ss:$16 sps:$4 sm:$0xff]  }
  0x76   :  { %1495 = vmatprep.subr.bf16.mxu1 %v2550_v47  ;;  %v2635_v47 = vld [vmem:[#allocation5 + $0x308] ss:$16 sps:$4 sm:$0xff]  }
  0x78   :  { %1334 = vmatpush1.bf16.msra.mxu0 %v2551_v50  ;;  %v2638_v50 = vld [vmem:[#allocation5 + $0x340] ss:$16 sps:$4 sm:$0xff]  }
  0x79   :  { %1496 = vmatpush1.bf16.msra.mxu1 %v2548_v48  ;;  %1335 = vmatprep.subr.bf16.mxu0 %v2552_v51  ;;  %v2640_v48 = vld [vmem:[#allocation5 + $0x344] ss:$16 sps:$4 sm:$0xff]   ;;  %v2641_v51 = vld [vmem:[#allocation5 + $0x328] ss:$16 sps:$4 sm:$0xff]  }
  0x7a   :  { %1497 = vmatprep.subr.bf16.mxu1 %v2556_v53  ;;  %v2649_v53 = vld [vmem:[#allocation5 + $0x34c] ss:$16 sps:$4 sm:$0xff]  }
  0x7c   :  { %1336 = vmatpush1.bf16.msra.mxu0 %v2557_v55  ;;  %v2647_v55 = vld [vmem:[#allocation5 + $0x348] ss:$16 sps:$4 sm:$0xff]  }
  0x7d   :  { %1498 = vmatpush1.bf16.msra.mxu1 %v2554_v54  ;;  %1337 = vmatprep.subr.bf16.mxu0 %v2558_v56  ;;  %v2644_v54 = vld [vmem:[#allocation5 + $0x360] ss:$16 sps:$4 sm:$0xff]   ;;  %v2652_v56 = vld [vmem:[#allocation5 + $0x384] ss:$16 sps:$4 sm:$0xff]  }
  0x7e   :  { %1499 = vmatprep.subr.bf16.mxu1 %v2562_v57  ;;  %v2655_v57 = vld [vmem:[#allocation5 + $0x36c] ss:$16 sps:$4 sm:$0xff]  }
  0x80   :  { %1338 = vmatpush1.bf16.msra.mxu0 %v2563_v59  ;;  %v2653_v59 = vld [vmem:[#allocation5 + $0x368] ss:$16 sps:$4 sm:$0xff]  }
  0x81   :  { %1500 = vmatpush1.bf16.msra.mxu1 %v2560_v58  ;;  %1339 = vmatprep.subr.bf16.mxu0 %v2564_v60  ;;  %v2650_v58 = vld [vmem:[#allocation5 + $0x380] ss:$16 sps:$4 sm:$0xff]   ;;  %v2658_v60 = vld [vmem:[#allocation5 + $0x3a4] ss:$16 sps:$4 sm:$0xff]  }
  0x82   :  { %1501 = vmatprep.subr.bf16.mxu1 %v2568_v61  ;;  %v2661_v61 = vld [vmem:[#allocation5 + $0x38c] ss:$16 sps:$4 sm:$0xff]  }
  0x84   :  { %1340 = vmatpush1.bf16.msra.mxu0 %v2569_v63  ;;  %v2659_v63 = vld [vmem:[#allocation5 + $0x388] ss:$16 sps:$4 sm:$0xff]  }
  0x85   :  { %1502 = vmatpush1.bf16.msra.mxu1 %v2566_v62  ;;  %1341 = vmatprep.subr.bf16.mxu0 %v2570_v1  ;;  %v2656_v62 = vld [vmem:[#allocation5 + $0x3a0] ss:$16 sps:$4 sm:$0xff]   ;;  %v2664_v1 = vld [vmem:[#allocation5 + $0x3c4] ss:$16 sps:$4 sm:$0xff]  }
  0x86   :  { %1503 = vmatprep.subr.bf16.mxu1 %v2574_v2  ;;  %v2667_v2 = vld [vmem:[#allocation5 + $0x3ac] ss:$16 sps:$4 sm:$0xff]  }
  0x88   :  { %1342 = vmatpush1.bf16.msra.mxu0 %v2575_v4  ;;  %v2665_v4 = vld [vmem:[#allocation5 + $0x3a8] ss:$16 sps:$4 sm:$0xff]  }
  0x89   :  { %1504 = vmatpush1.bf16.msra.mxu1 %v2572_v3  ;;  %1352 = vmatprep.subr.bf16.mxu0 %v2580_v5  ;;  %v2662_v3 = vld [vmem:[#allocation5 + $0x3c0] ss:$16 sps:$4 sm:$0xff]   ;;  %v2670_v5 = vld [vmem:[#allocation5 + $0x3e4] ss:$16 sps:$4 sm:$0xff]  }
  0x8a   :  { %1505 = vmatprep.subr.bf16.mxu1 %v2583_v6  ;;  %v2673_v6 = vld [vmem:[#allocation5 + $0x3cc] ss:$16 sps:$4 sm:$0xff]  }
  0x8b   :  { %1344 = vmatmul.mubr.bf16.vlgmr.msra.gmra.mrb[0].mxu0 %v2121_v7 }
  0x8c   :  { %1353 = vmatpush1.bf16.msra.mxu0 %v2578_v8  ;;  %1384 = vmatprep.mubr.bf16.mxu0 %v2124_v35  ;;  %v2671_v8 = vld [vmem:[#allocation5 + $0x3c8] ss:$16 sps:$4 sm:$0xff]  }
  0x8d   :  { %1506 = vmatpush1.bf16.msra.mxu1 %v2581_v9  ;;  %1354 = vmatprep.subr.bf16.mxu0 %v2586_v10  ;;  %v2678_v9 = vld [vmem:[#allocation5 + $0x404] ss:$16 sps:$4 sm:$0xff]   ;;  %v2681_v10 = vld [vmem:[#allocation5 + $0x3ec] ss:$16 sps:$4 sm:$0xff]  }
  0x8e   :  { %1516 = vmatprep.subr.bf16.mxu1 %v2589_v11  ;;  %v2123_v11 = vcombine.low %v3041_v32, %v3041_v32  ;;  %v2708_v32 = vld [vmem:[#allocation5 + $0x4a4] ss:$16 sps:$4 sm:$0xff]  }
  0x90   :  { %1508 = vmatmul.mubr.bf16.vlgmr.msra.gmra.mrb[4].mxu1 %v2121_v7  ;;  %1355 = vmatpush1.bf16.msra.mxu0 %v2584_v12  ;;  %v2668_v7 = vld [vmem:[#allocation5 + $0x3e0] ss:$16 sps:$4 sm:$0xff]  }
  0x91   :  { %1517 = vmatpush1.bf16.msra.mxu1 %v2587_v13  ;;  %1356 = vmatprep.subr.bf16.mxu0 %v2592_v14  ;;  %v2676_v12 = vld [vmem:[#allocation5 + $0x400] ss:$16 sps:$4 sm:$0xff]   ;;  %v2679_v13 = vld [vmem:[#allocation5 + $0x3e8] ss:$16 sps:$4 sm:$0xff]   ;;  %v2684_v14 = vld [vmem:[#allocation5 + $0x424] ss:$16 sps:$4 sm:$0xff]  }
  0x92   :  { %1518 = vmatprep.subr.bf16.mxu1 %v2595_v15  ;;  %1548 = vmatprep.mubr.bf16.mxu1 %v2124_v35  ;;  %v2687_v15 = vld [vmem:[#allocation5 + $0x40c] ss:$16 sps:$4 sm:$0xff]   ;;  %v2709_v35 = vld [vmem:[#allocation5 + $0x488] ss:$16 sps:$4 sm:$0xff]  }
  0x94   :  { %1357 = vmatpush1.bf16.msra.mxu0 %v2590_v16  ;;  %v3047_v16 = vld [vmem:[#allocation2 + $0x10] sm:$0xff] }
  0x95   :  { %1519 = vmatpush1.bf16.msra.mxu1 %v2593_v17  ;;  %1358 = vmatprep.subr.bf16.mxu0 %v2598_v18  ;;  %v2682_v17 = vld [vmem:[#allocation5 + $0x420] ss:$16 sps:$4 sm:$0xff]   ;;  %v2126_v18 = vcombine.high %v3047_v16, %v3047_v16 }
  0x96   :  { %1520 = vmatprep.subr.bf16.mxu1 %v2601_v19  ;;  %v2685_v19 = vld [vmem:[#allocation5 + $0x408] ss:$16 sps:$4 sm:$0xff]  }
  0x98   :  { %1359 = vmatpush1.bf16.msra.mxu0 %v2596_v20  ;;  %v2690_v20 = vld [vmem:[#allocation5 + $0x444] ss:$16 sps:$4 sm:$0xff]  }
  0x99   :  { %1521 = vmatpush1.bf16.msra.mxu1 %v2599_v21  ;;  %1360 = vmatprep.subr.bf16.mxu0 %v2604_v22  ;;  %v2693_v21 = vld [vmem:[#allocation5 + $0x42c] ss:$16 sps:$4 sm:$0xff]   ;;  %v2688_v22 = vld [vmem:[#allocation5 + $0x440] ss:$16 sps:$4 sm:$0xff]  }
  0x9a   :  { %1522 = vmatprep.subr.bf16.mxu1 %v2607_v23  ;;  %v2691_v23 = vld [vmem:[#allocation5 + $0x428] ss:$16 sps:$4 sm:$0xff]  }
  0x9c   :  { %1361 = vmatpush1.bf16.msra.mxu0 %v2602_v24  ;;  %v2696_v24 = vld [vmem:[#allocation5 + $0x464] ss:$16 sps:$4 sm:$0xff]  }
  0x9d   :  { %1523 = vmatpush1.bf16.msra.mxu1 %v2605_v25  ;;  %1362 = vmatprep.subr.bf16.mxu0 %v2610_v26  ;;  %v2699_v25 = vld [vmem:[#allocation5 + $0x44c] ss:$16 sps:$4 sm:$0xff]   ;;  %v2694_v26 = vld [vmem:[#allocation5 + $0x460] ss:$16 sps:$4 sm:$0xff]  }
  0x9e   :  { %1524 = vmatprep.subr.bf16.mxu1 %v2613_v27  ;;  %v2697_v27 = vld [vmem:[#allocation5 + $0x448] ss:$16 sps:$4 sm:$0xff]  }
  0xa0   :  { %1363 = vmatpush1.bf16.msra.mxu0 %v2608_v28  ;;  %v2702_v28 = vld [vmem:[#allocation5 + $0x484] ss:$16 sps:$4 sm:$0xff]  }
  0xa1   :  { %1525 = vmatpush1.bf16.msra.mxu1 %v2611_v29  ;;  %1364 = vmatprep.subr.bf16.mxu0 %v2616_v30  ;;  %v2705_v29 = vld [vmem:[#allocation5 + $0x46c] ss:$16 sps:$4 sm:$0xff]   ;;  %v2700_v30 = vld [vmem:[#allocation5 + $0x480] ss:$16 sps:$4 sm:$0xff]  }
  0xa2   :  { %1526 = vmatprep.subr.bf16.mxu1 %v2619_v31  ;;  %v2703_v31 = vld [vmem:[#allocation5 + $0x468] ss:$16 sps:$4 sm:$0xff]  }
  0xa4   :  { %1365 = vmatpush1.bf16.msra.mxu0 %v2614_v33  ;;  %v2711_v33 = vld [vmem:[#allocation5 + $0x48c] ss:$16 sps:$4 sm:$0xff]  }
  0xa5   :  { %1527 = vmatpush1.bf16.msra.mxu1 %v2617_v34  ;;  %1366 = vmatprep.subr.bf16.mxu0 %v2622_v36  ;;  %v2706_v34 = vld [vmem:[#allocation5 + $0x4a0] ss:$16 sps:$4 sm:$0xff]   ;;  %v2714_v36 = vld [vmem:[#allocation5 + $0x4c4] ss:$16 sps:$4 sm:$0xff]  }
  0xa6   :  { %1528 = vmatprep.subr.bf16.mxu1 %v2625_v37  ;;  %v2717_v37 = vld [vmem:[#allocation5 + $0x4ac] ss:$16 sps:$4 sm:$0xff]  }
  0xa8   :  { %1367 = vmatpush1.bf16.msra.mxu0 %v2620_v38  ;;  %v2712_v38 = vld [vmem:[#allocation5 + $0x4c0] ss:$16 sps:$4 sm:$0xff]  }
  0xa9   :  { %1529 = vmatpush1.bf16.msra.mxu1 %v2623_v39  ;;  %1368 = vmatprep.subr.bf16.mxu0 %v2628_v40  ;;  %v2715_v39 = vld [vmem:[#allocation5 + $0x4a8] ss:$16 sps:$4 sm:$0xff]   ;;  %v2720_v40 = vld [vmem:[#allocation5 + $0x4e4] ss:$16 sps:$4 sm:$0xff]  }
  0xaa   :  { %1530 = vmatprep.subr.bf16.mxu1 %v2631_v41  ;;  %v2723_v41 = vld [vmem:[#allocation5 + $0x4cc] ss:$16 sps:$4 sm:$0xff]  }
  0xac   :  { %1369 = vmatpush1.bf16.msra.mxu0 %v2626_v42  ;;  %v2718_v42 = vld [vmem:[#allocation5 + $0x4e0] ss:$16 sps:$4 sm:$0xff]  }
  0xad   :  { %1531 = vmatpush1.bf16.msra.mxu1 %v2629_v43  ;;  %1370 = vmatprep.subr.bf16.mxu0 %v2634_v44  ;;  %v2721_v43 = vld [vmem:[#allocation5 + $0x4c8] ss:$16 sps:$4 sm:$0xff]   ;;  %v2726_v44 = vld [vmem:[#allocation5 + $0x504] ss:$16 sps:$4 sm:$0xff]  }
  0xae   :  { %1532 = vmatprep.subr.bf16.mxu1 %v2637_v45  ;;  %v2729_v45 = vld [vmem:[#allocation5 + $0x4ec] ss:$16 sps:$4 sm:$0xff]  }
  0xb0   :  { %1371 = vmatpush1.bf16.msra.mxu0 %v2632_v46  ;;  %v2724_v46 = vld [vmem:[#allocation5 + $0x500] ss:$16 sps:$4 sm:$0xff]  }
  0xb1   :  { %1533 = vmatpush1.bf16.msra.mxu1 %v2635_v47  ;;  %1372 = vmatprep.subr.bf16.mxu0 %v2640_v48  ;;  %v2727_v47 = vld [vmem:[#allocation5 + $0x4e8] ss:$16 sps:$4 sm:$0xff]   ;;  %v2732_v48 = vld [vmem:[#allocation5 + $0x524] ss:$16 sps:$4 sm:$0xff]  }
  0xb2   :  { %1534 = vmatprep.subr.bf16.mxu1 %v2643_v49  ;;  %v2735_v49 = vld [vmem:[#allocation5 + $0x50c] ss:$16 sps:$4 sm:$0xff]  }
  0xb4   :  { %1373 = vmatpush1.bf16.msra.mxu0 %v2638_v50  ;;  %v2730_v50 = vld [vmem:[#allocation5 + $0x520] ss:$16 sps:$4 sm:$0xff]  }
  0xb5   :  { %1535 = vmatpush1.bf16.msra.mxu1 %v2641_v51  ;;  %1374 = vmatprep.subr.bf16.mxu0 %v2646_v52  ;;  %v2733_v51 = vld [vmem:[#allocation5 + $0x508] ss:$16 sps:$4 sm:$0xff]   ;;  %v2738_v52 = vld [vmem:[#allocation5 + $0x544] ss:$16 sps:$4 sm:$0xff]  }
  0xb6   :  { %1536 = vmatprep.subr.bf16.mxu1 %v2649_v53  ;;  %v2741_v53 = vld [vmem:[#allocation5 + $0x52c] ss:$16 sps:$4 sm:$0xff]  }
  0xb8   :  { %1375 = vmatpush1.bf16.msra.mxu0 %v2644_v54  ;;  %v2736_v54 = vld [vmem:[#allocation5 + $0x540] ss:$16 sps:$4 sm:$0xff]  }
  0xb9   :  { %1537 = vmatpush1.bf16.msra.mxu1 %v2647_v55  ;;  %1376 = vmatprep.subr.bf16.mxu0 %v2652_v56  ;;  %v2739_v55 = vld [vmem:[#allocation5 + $0x528] ss:$16 sps:$4 sm:$0xff]   ;;  %v2744_v56 = vld [vmem:[#allocation5 + $0x564] ss:$16 sps:$4 sm:$0xff]  }
  0xba   :  { %1538 = vmatprep.subr.bf16.mxu1 %v2655_v57  ;;  %v2747_v57 = vld [vmem:[#allocation5 + $0x54c] ss:$16 sps:$4 sm:$0xff]  }
  0xbc   :  { %1377 = vmatpush1.bf16.msra.mxu0 %v2650_v58  ;;  %v2742_v58 = vld [vmem:[#allocation5 + $0x560] ss:$16 sps:$4 sm:$0xff]  }
  0xbd   :  { %1539 = vmatpush1.bf16.msra.mxu1 %v2653_v59  ;;  %1378 = vmatprep.subr.bf16.mxu0 %v2658_v60  ;;  %v2745_v59 = vld [vmem:[#allocation5 + $0x548] ss:$16 sps:$4 sm:$0xff]   ;;  %v2750_v60 = vld [vmem:[#allocation5 + $0x584] ss:$16 sps:$4 sm:$0xff]  }
  0xbe   :  { %1540 = vmatprep.subr.bf16.mxu1 %v2661_v61  ;;  %v2753_v61 = vld [vmem:[#allocation5 + $0x56c] ss:$16 sps:$4 sm:$0xff]  }
  0xc0   :  { %1379 = vmatpush1.bf16.msra.mxu0 %v2656_v62  ;;  %v2748_v62 = vld [vmem:[#allocation5 + $0x580] ss:$16 sps:$4 sm:$0xff]  }
  0xc1   :  { %1541 = vmatpush1.bf16.msra.mxu1 %v2659_v63  ;;  %1380 = vmatprep.subr.bf16.mxu0 %v2664_v1  ;;  %v2751_v63 = vld [vmem:[#allocation5 + $0x568] ss:$16 sps:$4 sm:$0xff]   ;;  %v2756_v1 = vld [vmem:[#allocation5 + $0x5a4] ss:$16 sps:$4 sm:$0xff]  }
  0xc2   :  { %1542 = vmatprep.subr.bf16.mxu1 %v2667_v2  ;;  %v2759_v2 = vld [vmem:[#allocation5 + $0x58c] ss:$16 sps:$4 sm:$0xff]  }
  0xc4   :  { %1381 = vmatpush1.bf16.msra.mxu0 %v2662_v3  ;;  %v2754_v3 = vld [vmem:[#allocation5 + $0x5a0] ss:$16 sps:$4 sm:$0xff]  }
  0xc5   :  { %1543 = vmatpush1.bf16.msra.mxu1 %v2665_v4  ;;  %1382 = vmatprep.subr.bf16.mxu0 %v2670_v5  ;;  %v2757_v4 = vld [vmem:[#allocation5 + $0x588] ss:$16 sps:$4 sm:$0xff]   ;;  %v2762_v5 = vld [vmem:[#allocation5 + $0x5c4] ss:$16 sps:$4 sm:$0xff]  }
  0xc6   :  { %1544 = vmatprep.subr.bf16.mxu1 %v2673_v6  ;;  %v2765_v6 = vld [vmem:[#allocation5 + $0x5ac] ss:$16 sps:$4 sm:$0xff]  }
  0xc8   :  { %1383 = vmatpush1.bf16.msra.mxu0 %v2668_v7  ;;  %v2760_v7 = vld [vmem:[#allocation5 + $0x5c0] ss:$16 sps:$4 sm:$0xff]  }
  0xc9   :  { %1545 = vmatpush1.bf16.msra.mxu1 %v2671_v8  ;;  %1393 = vmatprep.subr.bf16.mxu0 %v2678_v9  ;;  %v2763_v8 = vld [vmem:[#allocation5 + $0x5a8] ss:$16 sps:$4 sm:$0xff]   ;;  %v2768_v9 = vld [vmem:[#allocation5 + $0x5e4] ss:$16 sps:$4 sm:$0xff]  }
  0xca   :  { %1546 = vmatprep.subr.bf16.mxu1 %v2681_v10  ;;  %v2771_v10 = vld [vmem:[#allocation5 + $0x5cc] ss:$16 sps:$4 sm:$0xff]  }
  0xcb   :  { %1385 = vmatmul.mubr.bf16.vlgmr.msra.gmra.mrb[0].mxu0 %v2123_v11 }
  0xcc   :  { %1394 = vmatpush1.bf16.msra.mxu0 %v2676_v12  ;;  %1425 = vmatprep.mubr.bf16.mxu0 %v2126_v18  ;;  %v2769_v12 = vld [vmem:[#allocation5 + $0x5c8] ss:$16 sps:$4 sm:$0xff]  }
  0xcd   :  { %1547 = vmatpush1.bf16.msra.mxu1 %v2679_v13  ;;  %1395 = vmatprep.subr.bf16.mxu0 %v2684_v14  ;;  %v2776_v13 = vld [vmem:[#allocation5 + $0x5ec] ss:$16 sps:$4 sm:$0xff]   ;;  %v2780_v14 = vld [vmem:[#allocation7 + $0x40] sm:$0xff]  }
  0xce   :  { %1557 = vmatprep.subr.bf16.mxu1 %v2687_v15  ;;  %v2125_v15 = vcombine.low %v3047_v16, %v3047_v16  ;;  %v2785_v16 = vld [vmem:[#allocation7 + $0x10] sm:$0xff]  }
  0xd0   :  { %1549 = vmatmul.mubr.bf16.vlgmr.msra.gmra.mrb[4].mxu1 %v2123_v11  ;;  %1396 = vmatpush1.bf16.msra.mxu0 %v2682_v17  ;;  %v2766_v11 = vld [vmem:[#allocation5 + $0x5e0] ss:$16 sps:$4 sm:$0xff]   ;;  %v2774_v17 = vld [vmem:[#allocation5 + $0x5e8] ss:$16 sps:$4 sm:$0xff]  }
  0xd1   :  { %1558 = vmatpush1.bf16.msra.mxu1 %v2685_v19  ;;  %1397 = vmatprep.subr.bf16.mxu0 %v2690_v20  ;;  %v2779_v19 = vld [vmem:[#allocation5 + $0x60c] ss:$16 sps:$4 sm:$0xff]  }
  0xd2   :  { %1559 = vmatprep.subr.bf16.mxu1 %v2693_v21  ;;  %1589 = vmatprep.mubr.bf16.mxu1 %v2126_v18  ;;  %v2781_v18 = vld [vmem:[#allocation7] sm:$0xff]   ;;  %v2782_v20 = vld [vmem:[#allocation7 + $0x48] sm:$0xff]  }
  0xd3   :  { %v2777_v21 = vld [vmem:[#allocation5 + $0x608] ss:$16 sps:$4 sm:$0xff]  }
  0xd4   :  { %1398 = vmatpush1.bf16.msra.mxu0 %v2688_v22  ;;  %v2783_v22 = vld [vmem:[#allocation7 + $0x8] sm:$0xff]  }
  0xd5   :  { %1560 = vmatpush1.bf16.msra.mxu1 %v2691_v23  ;;  %1399 = vmatprep.subr.bf16.mxu0 %v2696_v24  ;;  %v2788_v23 = vld [vmem:[#allocation7 + $0xc0] sm:$0xff]   ;;  %v2784_v24 = vld [vmem:[#allocation7 + $0x50] sm:$0xff]  }
  0xd6   :  { %1561 = vmatprep.subr.bf16.mxu1 %v2699_v25  ;;  %v2786_v25 = vld [vmem:[#allocation7 + $0x58] sm:$0xff]  }
  0xd8   :  { %1400 = vmatpush1.bf16.msra.mxu0 %v2694_v26  ;;  %v2787_v26 = vld [vmem:[#allocation7 + $0x18] sm:$0xff]  }
  0xd9   :  { %1562 = vmatpush1.bf16.msra.mxu1 %v2697_v27  ;;  %1401 = vmatprep.subr.bf16.mxu0 %v2702_v28  ;;  %v2790_v27 = vld [vmem:[#allocation7 + $0x60] sm:$0xff]  }
  0xda   :  { %1563 = vmatprep.subr.bf16.mxu1 %v2705_v29  ;;  %v2789_v28 = vld [vmem:[#allocation7 + $0x80] sm:$0xff]  }
  0xdb   :  { %v2791_v29 = vld [vmem:[#allocation7 + $0x20] sm:$0xff]  }
  0xdc   :  { %1402 = vmatpush1.bf16.msra.mxu0 %v2700_v30  ;;  %v2792_v30 = vld [vmem:[#allocation7 + $0xc8] sm:$0xff]  }
  0xdd   :  { %1564 = vmatpush1.bf16.msra.mxu1 %v2703_v31  ;;  %1403 = vmatprep.subr.bf16.mxu0 %v2708_v32  ;;  %v2794_v31 = vld [vmem:[#allocation7 + $0x68] sm:$0xff]   ;;  %v2820_v32 = vld [vmem:[#allocation2 + $0x18] ss:$0 sps:$4 sm:$0xff]  }
  0xde   :  { %1565 = vmatprep.subr.bf16.mxu1 %v2711_v33 }
  0xe0   :  { %1404 = vmatpush1.bf16.msra.mxu0 %v2706_v34 }
  0xe1   :  { %1566 = vmatpush1.bf16.msra.mxu1 %v2709_v35  ;;  %1405 = vmatprep.subr.bf16.mxu0 %v2714_v36 }
  0xe2   :  { %1567 = vmatprep.subr.bf16.mxu1 %v2717_v37  ;;  %v2795_v37 = vld [vmem:[#allocation7 + $0x28] sm:$0xff]  }
  0xe4   :  { %1406 = vmatpush1.bf16.msra.mxu0 %v2712_v38  ;;  %v2796_v38 = vld [vmem:[#allocation7 + $0xd0] sm:$0xff]  }
  0xe5   :  { %1568 = vmatpush1.bf16.msra.mxu1 %v2715_v39  ;;  %1407 = vmatprep.subr.bf16.mxu0 %v2720_v40  ;;  %v2797_v39 = vld [vmem:[#allocation7 + $0x90] sm:$0xff]  }
  0xe6   :  { %1569 = vmatprep.subr.bf16.mxu1 %v2723_v41  ;;  %v2798_v40 = vld [vmem:[#allocation7 + $0x70] sm:$0xff]  }
  0xe7   :  { %v2799_v41 = vld [vmem:[#allocation7 + $0x30] sm:$0xff]  }
  0xe8   :  { %1408 = vmatpush1.bf16.msra.mxu0 %v2718_v42  ;;  %v2800_v42 = vld [vmem:[#allocation7 + $0xd8] sm:$0xff]  }
  0xe9   :  { %1570 = vmatpush1.bf16.msra.mxu1 %v2721_v43  ;;  %1409 = vmatprep.subr.bf16.mxu0 %v2726_v44  ;;  %v2801_v43 = vld [vmem:[#allocation7 + $0x98] sm:$0xff]  }
  0xea   :  { %1571 = vmatprep.subr.bf16.mxu1 %v2729_v45  ;;  %v2802_v44 = vld [vmem:[#allocation7 + $0x78] sm:$0xff]  }
  0xeb   :  { %v2803_v45 = vld [vmem:[#allocation7 + $0x38] sm:$0xff]  }
  0xec   :  { %1410 = vmatpush1.bf16.msra.mxu0 %v2724_v46  ;;  %v2804_v46 = vld [vmem:[#allocation7 + $0xe0] sm:$0xff]  }
  0xed   :  { %1572 = vmatpush1.bf16.msra.mxu1 %v2727_v47  ;;  %1411 = vmatprep.subr.bf16.mxu0 %v2732_v48  ;;  %v2805_v47 = vld [vmem:[#allocation7 + $0xa0] sm:$0xff]   ;;  %v2806_v48 = vld [vmem:[#allocation7 + $0xe8] sm:$0xff]  }
  0xee   :  { %1573 = vmatprep.subr.bf16.mxu1 %v2735_v49  ;;  %v2807_v49 = vld [vmem:[#allocation7 + $0xa8] sm:$0xff]  }
  0xf0   :  { %1412 = vmatpush1.bf16.msra.mxu0 %v2730_v50  ;;  %v2808_v50 = vld [vmem:[#allocation7 + $0xf0] sm:$0xff]  }
  0xf1   :  { %1574 = vmatpush1.bf16.msra.mxu1 %v2733_v51  ;;  %1413 = vmatprep.subr.bf16.mxu0 %v2738_v52  ;;  %v2809_v51 = vld [vmem:[#allocation7 + $0xb0] sm:$0xff]   ;;  %v2810_v52 = vld [vmem:[#allocation7 + $0xf8] sm:$0xff]  }
  0xf2   :  { %1575 = vmatprep.subr.bf16.mxu1 %v2741_v53  ;;  %v2811_v53 = vld [vmem:[#allocation7 + $0xb8] sm:$0xff]  }
  0xf4   :  { %1414 = vmatpush1.bf16.msra.mxu0 %v2736_v54  ;;  %v2948_v54 = vmov 0.0  }
  0xf5   :  { %1576 = vmatpush1.bf16.msra.mxu1 %v2739_v55  ;;  %1415 = vmatprep.subr.bf16.mxu0 %v2744_v56  ;;  %v283_v55 = vlaneseq }
  0xf6   :  { %1577 = vmatprep.subr.bf16.mxu1 %v2747_v57 }
  0xf7   :  { %v284_v56 = vshrl.u32 %v283_v55, 7 }
  0xf8   :  { %1416 = vmatpush1.bf16.msra.mxu0 %v2742_v58  ;;  %v281_v58 = vld [vmem:[%s3087_s2] sm:$0xf] }
  0xf9   :  { %1578 = vmatpush1.bf16.msra.mxu1 %v2745_v59  ;;  %1417 = vmatprep.subr.bf16.mxu0 %v2750_v60  ;;  %v285_v57 = vsub.s32 0, %v284_v56  ;;  %v289_v59 = vsub.s32 1, %v284_v56 }
  0xfa   :  { %1579 = vmatprep.subr.bf16.mxu1 %v2753_v61 }
  0xfb   :  { %v286_v60 = vrot.slane %v281_v58, %v285_v57  ;;  %v290_v61 = vrot.slane %v281_v58, %v289_v59 }
  0xfc   :  { %1418 = vmatpush1.bf16.msra.mxu0 %v2748_v62 }
  0xfd   :  { %1580 = vmatpush1.bf16.msra.mxu1 %v2751_v63  ;;  %1419 = vmatprep.subr.bf16.mxu0 %v2756_v1 }
  0xfe   :  { %1581 = vmatprep.subr.bf16.mxu1 %v2759_v2 }
 0x100   :  { %1420 = vmatpush1.bf16.msra.mxu0 %v2754_v3 }
 0x101   :  { %1582 = vmatpush1.bf16.msra.mxu1 %v2757_v4  ;;  %1421 = vmatprep.subr.bf16.mxu0 %v2762_v5 }
 0x102   :  { %1583 = vmatprep.subr.bf16.mxu1 %v2765_v6 }
 0x104   :  { %1422 = vmatpush1.bf16.msra.mxu0 %v2760_v7 }
 0x105   :  { %1584 = vmatpush1.bf16.msra.mxu1 %v2763_v8  ;;  %1423 = vmatprep.subr.bf16.mxu0 %v2768_v9 }
 0x106   :  { %1585 = vmatprep.subr.bf16.mxu1 %v2771_v10  ;;  %v2812_v10 = vld [vmem:[#allocation8] sm:$0xff]  }
 0x108   :  { %1424 = vmatpush1.bf16.msra.mxu0 %v2766_v11 }
 0x109   :  { %1586 = vmatpush1.bf16.msra.mxu1 %v2769_v12  ;;  %2368 = vmatprep.subr.bf16.mxu0 %v2780_v14  ;;  %v293_v12 = vsub.s32 2, %v284_v56  ;;  %v2813_v14 = vld [vmem:[#allocation8 + $0x8] sm:$0xff]  }
 0x10a   :  { %1587 = vmatprep.subr.bf16.mxu1 %v2776_v13  ;;  %v297_v13 = vsub.s32 3, %v284_v56 }
 0x10b   :  { %1426 = vmatmul.mubr.bf16.vlgmr.msra.gmra.mrb[0].mxu0 %v2125_v15 }
 0x10c   :  { %2369 = vmatpush3.bf16.msra.mxu0 %v2781_v18 }
 0x10d   :  { %1588 = vmatpush1.bf16.msra.mxu1 %v2774_v17  ;;  %2370 = vmatprep.subr.bf16.mxu0 %v2782_v20  ;;  %v298_v17 = vrot.slane %v281_v58, %v297_v13 }
 0x10e   :  { %1598 = vmatprep.subr.bf16.mxu1 %v2779_v19 }
 0x110   :  { %1590 = vmatmul.mubr.bf16.vlgmr.msra.gmra.mrb[4].mxu1 %v2125_v15  ;;  %2371 = vmatpush3.bf16.msra.mxu0 %v2783_v22  ;;  %v294_v15 = vrot.slane %v281_v58, %v293_v12 }
 0x111   :  { %1599 = vmatpush1.bf16.msra.mxu1 %v2777_v21  ;;  %1630 = vmatprep.mubr.bf16.mxu1 %v2947_v0  ;;  %v2793_v0 = vld [vmem:[#allocation7 + $0x88] sm:$0xff]  }
 0x112   :  { %2390 = vmatprep.subr.bf16.mxu1 %v2788_v23  ;;  %2372 = vmatprep.subr.bf16.mxu0 %v2784_v24 }
 0x114   :  { %2373 = vmatpush3.bf16.msra.mxu0 %v2785_v16 }
 0x115   :  { %2374 = vmatprep.subr.bf16.mxu0 %v2786_v25 }
 0x118   :  { %2375 = vmatpush3.bf16.msra.mxu0 %v2787_v26 }
 0x119   :  { %2376 = vmatprep.subr.bf16.mxu0 %v2790_v27  ;;  %v2814_v27 = vld [vmem:[#allocation8 + $0x10] sm:$0xff]  }
 0x11c   :  { %2325 = vmatmul.mubr.msk.bf16.vlgmr.msra.gmra.mrb[4].mxu1 %vm1307_vm0, %v2820_v32  ;;  %2377 = vmatpush3.bf16.msra.mxu0 %v2791_v29  ;;  %v2816_v29 = vld [vmem:[#allocation8 + $0x20] sm:$0xff]   ;;  %v2819_v32 = vld [vmem:[#allocation8 + $0x38] sm:$0xff]  }
 0x11d   :  { %2391 = vmatpush3.bf16.msra.mxu1 %v2789_v28  ;;  %2378 = vmatprep.subr.bf16.mxu0 %v2794_v31  ;;  %v2815_v28 = vld [vmem:[#allocation8 + $0x18] sm:$0xff]   ;;  %v2818_v31 = vld [vmem:[#allocation8 + $0x30] sm:$0xff]  }
 0x11e   :  { %2392 = vmatprep.subr.bf16.mxu1 %v2792_v30  ;;  %v2817_v30 = vld [vmem:[#allocation8 + $0x28] sm:$0xff]  }
 0x120   :  { %2379 = vmatpush3.bf16.msra.mxu0 %v2795_v37  ;;  %v2326_v37 = vld [vmem:[%s3089_s4] ss:$0 sm:$0xff]  ;;  %s2909_s4 = scalar_lea.vmem %s2111_s8, 128 }
 0x121   :  { %2393 = vmatpush3.bf16.msra.mxu1 %v2793_v0  ;;  %2380 = vmatprep.subr.bf16.mxu0 %v2798_v40  ;;  %p2910_p4 = scmp.ne.s32.totalorder %s2111_s8, %s2909_s4  ;;  %p2915_p6 = scmp.lt.s32.totalorder %s2909_s4, %s2909_s4 }
 0x122   :  { %2394 = vmatprep.subr.bf16.mxu1 %v2796_v38 }
 0x123   :  { %v1468_v33 = vpop.f32.mrb[0].mxu1  ;;  %p2916_p7 = por %p2915_p6, %p2914_p5 }
 0x124   :  { %v1470_v34 = vpop.f32.mrb[1].mxu1  ;;  %2381 = vmatpush3.bf16.msra.mxu0 %v2799_v41 }
 0x125   :  { %v1472_v35 = vpop.f32.mrb[2].mxu1  ;;  %2395 = vmatpush3.bf16.msra.mxu1 %v2797_v39  ;;  %2382 = vmatprep.subr.bf16.mxu0 %v2802_v44  ;;  %p2917_p8 = pnand %p2916_p7, %p2910_p4 }
 0x126   :  { %v1473_v36 = vpop.f32.mrb[3].mxu1  ;;  %2396 = vmatprep.subr.bf16.mxu1 %v2800_v42 }
 0x128   :  { %2383 = vmatpush3.bf16.msra.mxu0 %v2803_v45 }
 0x129   :  { %2397 = vmatpush3.bf16.msra.mxu1 %v2801_v43  ;;  %2421 = vmatprep.subr.bf16.mxu0 %v2948_v54 }
 0x12a   :  { %2398 = vmatprep.subr.bf16.mxu1 %v2804_v46 }
 0x12d   :  { %2399 = vmatpush3.bf16.msra.mxu1 %v2805_v47  ;;  %v2359_v47 = vld [vmem:[%s3091_s6] ss:$0 sm:$0xff] }
 0x12e   :  { %2400 = vmatprep.subr.bf16.mxu1 %v2806_v48 }
 0x131   :  { %2401 = vmatpush3.bf16.msra.mxu1 %v2807_v49 }
 0x132   :  { %2402 = vmatprep.subr.bf16.mxu1 %v2808_v50 }
 0x135   :  { %2403 = vmatpush3.bf16.msra.mxu1 %v2809_v51 }
 0x136   :  { %2404 = vmatprep.subr.bf16.mxu1 %v2810_v52 }
 0x139   :  { %2405 = vmatpush3.bf16.msra.mxu1 %v2811_v53 }
 0x1de   :  { %v1427_v62 = vpop.f32.mrb[0].mxu0 }
 0x1df   :  { %v2441_v63 = vadd.f32 %v1427_v62, %v286_v60  ;;  %v1429_v1 = vpop.f32.mrb[1].mxu0 }
 0x1e0   :  { %v2443_v2 = vadd.f32 %v1429_v1, %v290_v61  ;;  %v1431_v3 = vpop.f32.mrb[2].mxu0 }
 0x1e1   :  { %v2442_v4 = vadd.f32 %v2441_v63, %v1468_v33  ;;  %v1432_v5 = vpop.f32.mrb[3].mxu0 }
 0x1e2   :  { %v2444_v6 = vadd.f32 %v2443_v2, %v1470_v34 }
 0x1e3   :  { %v1639_v7 = vmax.f32 %v2442_v4, 0.0 }
 0x1e4   :  { %v1640_v8 = vmax.f32 %v2444_v6, 0.0 }
 0x1e5   :  { %v1643_v11 = vpack.c.bf16 %v1639_v7, %v1639_v7 }
 0x1e6   :  { %v1644_v9 = vpack.c.bf16 %v1640_v8, %v1640_v8 }
 0x1e8   :  { %1942 = vmatprep.mubr.bf16.mxu0 %v1644_v9 }
 0x1e9   :  { %1943 = vmatmul.mubr.bf16.vlgmr.msra.gmra.mrb[4].mxu0 %v1643_v11 }
 0x1ea   :  { %2422 = vmatpush3.bf16.msra.mxu0 %v2812_v10  ;;  %2437 = vmatprep.mubr.msk.bf16.mxu0 %vm2949_vm1, %v2948_v54 }
 0x1eb   :  { %2423 = vmatprep.subr.bf16.mxu0 %v2948_v54 }
 0x1ee   :  { %2424 = vmatpush3.bf16.msra.mxu0 %v2813_v14 }
 0x1ef   :  { %v1632_v18 = vpop.f32.mrb[4].mxu1  ;;  %2425 = vmatprep.subr.bf16.mxu0 %v2948_v54 }
 0x1f0   :  { %v2445_v19 = vadd.f32 %v1632_v18, %v294_v15  ;;  %v1634_v20 = vpop.f32.mrb[5].mxu1 }
 0x1f1   :  { %v2446_v21 = vadd.f32 %v1634_v20, %v298_v17  ;;  %v1636_v22 = vpop.f32.mrb[6].mxu1 }
 0x1f2   :  { %v1641_v23 = vmax.f32 %v2445_v19, 0.0  ;;  %v1637_v24 = vpop.f32.mrb[7].mxu1  ;;  %2426 = vmatpush3.bf16.msra.mxu0 %v2814_v27 }
 0x1f3   :  { %v1642_v16 = vmax.f32 %v2446_v21, 0.0  ;;  %2427 = vmatprep.subr.bf16.mxu0 %v2948_v54 }
 0x1f4   :  { %v1645_v26 = vpack.c.bf16 %v1641_v23, %v1641_v23 }
 0x1f5   :  { %v1646_v25 = vpack.c.bf16 %v1642_v16, %v1642_v16 }
 0x1f6   :  { %2428 = vmatpush3.bf16.msra.mxu0 %v2815_v28 }
 0x1f7   :  { %1982 = vmatprep.mubr.bf16.mxu1 %v1646_v25  ;;  %2429 = vmatprep.subr.bf16.mxu0 %v2948_v54 }
 0x1f8   :  { %1983 = vmatmul.mubr.bf16.vlgmr.msra.gmra.mrb[8].mxu1 %v1645_v26 }
 0x1fa   :  { %2430 = vmatpush3.bf16.msra.mxu0 %v2816_v29 }
 0x1fb   :  { %2431 = vmatprep.subr.bf16.mxu0 %v2948_v54 }
 0x1fe   :  { %2432 = vmatpush3.bf16.msra.mxu0 %v2817_v30 }
 0x1ff   :  { %2433 = vmatprep.subr.bf16.mxu0 %v2948_v54 }
 0x202   :  { %2434 = vmatpush3.bf16.msra.mxu0 %v2818_v31 }
 0x203   :  { %2435 = vmatprep.subr.bf16.mxu0 %v2948_v54 }
 0x206   :  { %2436 = vmatpush3.bf16.msra.mxu0 %v2819_v32 }
 0x2bc   :  { %v2384_v0 = vpop.f32.mrb[4].mxu0 }
 0x2bd   :  { %v2385_v33 = vpop.f32.mrb[5].mxu0 }
 0x2be   :  { %v2386_v34 = vadd.f32 %v2385_v33, %v2384_v0  ;;  %v2387_v35 = vpop.f32.mrb[6].mxu0 }
 0x2bf   :  { %v2388_v36 = vpop.f32.mrb[7].mxu0 }
 0x2c0   :  { %v1945_v40 = vadd.f32 %v2386_v34, %v2326_v37 }
 0x2cb   :  { %v2406_v38 = vpop.f32.mrb[8].mxu1 }
 0x2cc   :  { %v2407_v39 = vpop.f32.mrb[9].mxu1 }
 0x2cd   :  { %v2408_v41 = vadd.f32 %v2407_v39, %v2406_v38  ;;  %v2409_v42 = vpop.f32.mrb[10].mxu1 }
 0x2ce   :  { %v2410_v43 = vpop.f32.mrb[11].mxu1 }
 0x2cf   :  { %v1985_v44 = vadd.f32 %v2408_v41, %v1945_v40 }
 0x2d1   :  { %v1990_v45 = vmax.f32 %v1985_v44, 0.0 }
 0x2d3   :  { %v1991_v46 = vpack.c.bf16 %v1990_v45, %v1990_v45 }
 0x2d5   :  { %2438 = vmatmul.mubr.bf16.vlgmr.msra.gmra.mrb[8].mxu0 %v1991_v46 }
 0x3a8   :  { %v2097_v48 = vpop.f32.mrb[8].mxu0 }
 0x3a9   :  { %v2098_v49 = vadd.f32 %v2359_v47, %v2097_v48  ;;  %v2439_v50 = vpop.f32.mrb[9].mxu0 }
 0x3aa   :  { %v2100_v51 = vpop.f32.mrb[10].mxu0 }
 0x3ab   :  { %2103 = vst [vmem:[#allocation10] sm:$0xff] %v2098_v49  ;;  %v2440_v52 = vpop.f32.mrb[11].mxu0 }
 0x3ac   :  { %2920 = shalt.err (!%p2917_p8)
}
 0x3ad   :  { %s2921_s6 = scalar_lea.hbm %s3092_s7, 128 }
 0x3ae   :  { %p2922_p9 = scmp.ne.s32.totalorder %s3092_s7, %s2921_s6  ;;  %p2925_p10 = scmp.lt.u32.totalorder %s2921_s6, %s3092_s7 }
 0x3b0   :  { %p2927_p11 = pnand %p2925_p10, %p2922_p9 }
 0x3b2   :  { %2930 = shalt.err (!%p2927_p11)
}
 0x3b3   :  { %2113 = dma.vmem_to_hbm [thread:$0]  %s2111_s8, 128, %s3092_s7, [#allocation4]  }
 0x3b4   :  { %2937 = dma.done.wait [#allocation4], 128  }
 0x3b5   :  { %2938 = vsyncadd [#allocation4], 4294967168 }
 0x3b6   :  { %2117 = vsyncpa [#allocation3], 1 }
 0x3b7   :  { %2118 = vsyncpa [#allocation6], 1 }
 0x3b8   :  { %2119 = vsyncpa [#allocation9], 1 }
 0x3b9   :  { %2120 = vsyncpa [#allocation4], 1 }

</bundles_post_ra>
